<compile_context>
chip_gen: v6e
topology: v6e:2x2x1
jax: 0.10.0
libtpu: 0.0.40
codegen_flags: <defaults>
</compile_context>

<pallas_src>
import functools
import math

import jax
import jax.numpy as jnp
from jax.experimental import pallas as pl
from jax.experimental.pallas import tpu as pltpu


def _round_up(x, m):
    return (x + m - 1) // m * m


# ----------------------------------------------------------------------------
# Pallas kernels
# ----------------------------------------------------------------------------
def _matmul_bias_kernel(x_ref, w_ref, b_ref, o_ref, acc_ref, *, activation):
    """Tiled o = act(x @ w + b); grid = (M tiles, N tiles, K tiles)."""
    @pl.when(pl.program_id(2) == 0)
    def _():
        acc_ref[...] = jnp.zeros_like(acc_ref)

    acc_ref[...] += jnp.dot(x_ref[...], w_ref[...],
                            preferred_element_type=jnp.float32)

    @pl.when(pl.program_id(2) == pl.num_programs(2) - 1)
    def _():
        y = acc_ref[...] + b_ref[...]            # bias only on last K step
        if activation == "gelu":
            y = jax.nn.gelu(y, approximate=True)
        o_ref[...] = y.astype(o_ref.dtype)


def _vit_branch_kernel(p_ref, w1_ref, b1_ref, pool_ref, w2_ref, b2_ref, o_ref):
    """Simplified ViT: patch-embed -> GELU -> mean-pool (as matmul) -> head.

    p:(B*P, Dp)bf16  w1:(Dp,H)bf16  b1:(1,H)f32  pool:(B,B*P)bf16
    w2:(H,H)bf16  b2:(1,H)f32  o:(B,H)f32
    """
    h = jnp.dot(p_ref[...], w1_ref[...],
                preferred_element_type=jnp.float32) + b1_ref[...]
    h = jax.nn.gelu(h, approximate=True)
    # mean over patches as a block-diagonal (B, B*P) matmul -> stays on MXU
    pooled = jnp.dot(pool_ref[...], h.astype(jnp.bfloat16),
                     preferred_element_type=jnp.float32)
    feat = jnp.dot(pooled.astype(jnp.bfloat16), w2_ref[...],
                   preferred_element_type=jnp.float32) + b2_ref[...]
    o_ref[...] = feat.astype(o_ref.dtype)


def _gpt_block_kernel(h0_ref, wqkv_ref, bqkv_ref, wo_ref, bo_ref,
                      wm1_ref, bm1_ref, wm2_ref, bm2_ref, o_ref,
                      *, scale, hp):
    """Fused GPT-2-style block for one batch element (grid over batch).

    h0:(1,T,H)f32  wqkv:(H,3H)bf16  biases f32  o:(1,T,H)f32
    Everything stays VMEM-resident; softmax/residuals in f32.
    """
    x = h0_ref[0]                                   # (T, H) f32
    xb = x.astype(jnp.bfloat16)

    qkv = jnp.dot(xb, wqkv_ref[...],
                  preferred_element_type=jnp.float32) + bqkv_ref[...]
    q = qkv[:, :hp]
    k = qkv[:, hp:2 * hp]
    v = qkv[:, 2 * hp:]

    t = q.shape[0]
    s = jax.lax.dot_general(
        q.astype(jnp.bfloat16), k.astype(jnp.bfloat16),
        (((1,), (1,)), ((), ())),
        preferred_element_type=jnp.float32) * scale        # (T, T) f32
    row = jax.lax.broadcasted_iota(jnp.int32, (t, t), 0)
    col = jax.lax.broadcasted_iota(jnp.int32, (t, t), 1)
    s = jnp.where(col <= row, s, jnp.float32(-1e30))       # mask kept in f32
    m = jnp.max(s, axis=-1, keepdims=True)
    p = jnp.exp(s - m)
    p = p * pl.reciprocal(jnp.sum(p, axis=-1, keepdims=True), approx=True)

    attn = jnp.dot(p.astype(jnp.bfloat16), v.astype(jnp.bfloat16),
                   preferred_element_type=jnp.float32)      # (T, H) f32

    h1 = x + jnp.dot(attn.astype(jnp.bfloat16), wo_ref[...],
                     preferred_element_type=jnp.float32) + bo_ref[...]
    m1 = jnp.dot(h1.astype(jnp.bfloat16), wm1_ref[...],
                 preferred_element_type=jnp.float32) + bm1_ref[...]
    m1 = jax.nn.gelu(m1, approximate=True)
    h2 = h1 + jnp.dot(m1.astype(jnp.bfloat16), wm2_ref[...],
                      preferred_element_type=jnp.float32) + bm2_ref[...]
    o_ref[0] = h2.astype(o_ref.dtype)


# ----------------------------------------------------------------------------
# Wrappers
# ----------------------------------------------------------------------------
def pallas_matmul_bias(x, w, b, activation=None, tm=256, tn=256, tk=512):
    """Tiled, lane-padded, bf16-input matmul + bias (+ optional GELU)."""
    m, kdim = x.shape
    _, n = w.shape

    mp = _round_up(m, 8)
    tm = mp if mp <= tm else tm
    mp = _round_up(mp, tm)
    np_ = _round_up(n, 128)
    tn = np_ if np_ <= tn else tn
    np_ = _round_up(np_, tn)
    kp = _round_up(kdim, 128)
    tk = kp if kp <= tk else tk
    kp = _round_up(kp, tk)

    xp = jnp.pad(x, ((0, mp - m), (0, kp - kdim))).astype(jnp.bfloat16)
    wp = jnp.pad(w, ((0, kp - kdim), (0, np_ - n))).astype(jnp.bfloat16)
    bp = jnp.pad(b.reshape(1, -1), ((0, 0), (0, np_ - n))).astype(jnp.float32)

    kernel = functools.partial(_matmul_bias_kernel, activation=activation)
    out = pl.pallas_call(
        kernel,
        out_shape=jax.ShapeDtypeStruct((mp, np_), jnp.float32),
        grid=(mp // tm, np_ // tn, kp // tk),
        in_specs=[
            pl.BlockSpec((tm, tk), lambda i, j, kk: (i, kk)),
            pl.BlockSpec((tk, tn), lambda i, j, kk: (kk, j)),
            pl.BlockSpec((1, tn), lambda i, j, kk: (0, j)),
        ],
        out_specs=pl.BlockSpec((tm, tn), lambda i, j, kk: (i, j)),
        scratch_shapes=[pltpu.VMEM((tm, tn), jnp.float32)],
        compiler_params=pltpu.CompilerParams(
            dimension_semantics=("parallel", "parallel", "arbitrary")),
    )(xp, wp, bp)
    return out[:m, :n]


def pallas_vit_branch(patches2d, w1, b1, pool, w2, b2):
    bp, dp = patches2d.shape
    hp = w1.shape[1]
    bsz = pool.shape[0]
    return pl.pallas_call(
        _vit_branch_kernel,
        out_shape=jax.ShapeDtypeStruct((bsz, hp), jnp.float32),
        in_specs=[
            pl.BlockSpec((bp, dp), lambda: (0, 0)),
            pl.BlockSpec((dp, hp), lambda: (0, 0)),
            pl.BlockSpec((1, hp), lambda: (0, 0)),
            pl.BlockSpec((bsz, bp), lambda: (0, 0)),
            pl.BlockSpec((hp, hp), lambda: (0, 0)),
            pl.BlockSpec((1, hp), lambda: (0, 0)),
        ],
        out_specs=pl.BlockSpec((bsz, hp), lambda: (0, 0)),
    )(patches2d.astype(jnp.bfloat16), w1.astype(jnp.bfloat16),
      b1.reshape(1, hp), pool.astype(jnp.bfloat16),
      w2.astype(jnp.bfloat16), b2.reshape(1, hp))


def pallas_gpt_block(h0, wqkv, bqkv, wo, bo, wm1, bm1, wm2, bm2,
                     *, logical_hidden):
    bsz, t, hp = h0.shape
    mp = wm1.shape[1]
    kernel = functools.partial(_gpt_block_kernel,
                               scale=1.0 / math.sqrt(logical_hidden), hp=hp)
    return pl.pallas_call(
        kernel,
        out_shape=jax.ShapeDtypeStruct((bsz, t, hp), jnp.float32),
        grid=(bsz,),
        in_specs=[
            pl.BlockSpec((1, t, hp), lambda b: (b, 0, 0)),
            pl.BlockSpec((hp, 3 * hp), lambda b: (0, 0)),
            pl.BlockSpec((1, 3 * hp), lambda b: (0, 0)),
            pl.BlockSpec((hp, hp), lambda b: (0, 0)),
            pl.BlockSpec((1, hp), lambda b: (0, 0)),
            pl.BlockSpec((hp, mp), lambda b: (0, 0)),
            pl.BlockSpec((1, mp), lambda b: (0, 0)),
            pl.BlockSpec((mp, hp), lambda b: (0, 0)),
            pl.BlockSpec((1, hp), lambda b: (0, 0)),
        ],
        out_specs=pl.BlockSpec((1, t, hp), lambda b: (b, 0, 0)),
        compiler_params=pltpu.CompilerParams(
            dimension_semantics=("parallel",)),
    )(h0, wqkv.astype(jnp.bfloat16), bqkv.reshape(1, -1),
      wo.astype(jnp.bfloat16), bo.reshape(1, -1),
      wm1.astype(jnp.bfloat16), bm1.reshape(1, -1),
      wm2.astype(jnp.bfloat16), bm2.reshape(1, -1))


# ----------------------------------------------------------------------------
# Model glue
# ----------------------------------------------------------------------------
def patchify_nchw(image, ph, pw):
    b, c, h, w = image.shape
    x = image.reshape(b, c, h // ph, ph, w // pw, pw)
    x = x.transpose(0, 2, 4, 1, 3, 5)                  # (B, Ph, Pw, C, ph, pw)
    return x.reshape(b, (h // ph) * (w // pw), c * ph * pw)


def _pad_to(x, shape):
    return jnp.pad(x, [(0, s - d) for d, s in zip(x.shape, shape)])


def init_params(key, *, patch_dim, hidden, vocab, max_t, mlp, num_classes,
                hidden_pad=128, mlp_pad=128, patch_dim_pad=256):
    """Logical-size init (matches previous stand-in), zero-padded to lane-dense
    shapes (hidden->128, mlp->128, patch_dim->256).  Zero padding is exactly
    neutral through matmul / GELU / residual / softmax."""
    ks = jax.random.split(key, 16)
    n = lambda i, shape, s=0.02: (s * jax.random.normal(ks[i], shape)).astype(jnp.float32)
    z = lambda shape: jnp.zeros(shape, jnp.float32)
    hp, mpad, dpp = hidden_pad, mlp_pad, patch_dim_pad

    wq = _pad_to(n(4, (hidden, hidden)), (hp, hp))
    wk = _pad_to(n(5, (hidden, hidden)), (hp, hp))
    wv = _pad_to(n(6, (hidden, hidden)), (hp, hp))
    wqkv = jnp.concatenate([wq, wk, wv], axis=1)       # fused (H, 3H)

    return dict(
        # ViT branch
        vit_w1=_pad_to(n(0, (patch_dim, hidden)), (dpp, hp)), vit_b1=z((hp,)),
        vit_w2=_pad_to(n(1, (hidden, hidden)), (hp, hp)),     vit_b2=z((hp,)),
        # GPT-2 branch
        wte=_pad_to(n(2, (vocab, hidden)), (vocab, hp)),
        wpe=_pad_to(n(3, (max_t, hidden)), (max_t, hp)),
        wqkv=wqkv, bqkv=z((3 * hp,)),
        wo=_pad_to(n(7, (hidden, hidden)), (hp, hp)), bo=z((hp,)),
        w_mlp1=_pad_to(n(8, (hidden, mlp)), (hp, mpad)), b_mlp1=z((mpad,)),
        w_mlp2=_pad_to(n(9, (mlp, hidden)), (mpad, hp)), b_mlp2=z((hp,)),
        # shared classification head (N padded to 128 inside the matmul wrapper)
        fc_w=_pad_to(n(10, (hidden, num_classes)), (hp, num_classes)),
        fc_b=z((num_classes,)),
    )


def calligraphy_forward(params, image, text, *, patch=8, logical_hidden=32):
    bsz = image.shape[0]
    hp = params["wte"].shape[1]
    t = text.shape[1]
    n_patch = (image.shape[2] // patch) * (image.shape[3] // patch)

    # --- image branch (simplified ViT) -> (B, Hp) ---
    patches = patchify_nchw(image, patch, patch)            # (B, P, C*ph*pw)
    dp = patches.shape[-1]
    dpp = params["vit_w1"].shape[0]
    patches2d = jnp.pad(patches.reshape(bsz * n_patch, dp),
                        ((0, 0), (0, dpp - dp)))             # lane-dense 2D slab
    pool = jnp.repeat(jnp.eye(bsz, dtype=jnp.float32),
                      n_patch, axis=1) / n_patch             # (B, B*P) mean-pool
    image_features = pallas_vit_branch(
        patches2d, params["vit_w1"], params["vit_b1"],
        pool, params["vit_w2"], params["vit_b2"])

    # --- text branch (fused simplified GPT-2 block) -> (B, T, Hp) ---
    # TODO(synk): token/position embedding gather stays in XLA glue (no clean
    #   Pallas gather primitive needed at these sizes).
    h0 = params["wte"][text] + params["wpe"][:t][None, :, :]
    text_features = pallas_gpt_block(
        h0, params["wqkv"], params["bqkv"], params["wo"], params["bo"],
        params["w_mlp1"], params["b_mlp1"], params["w_mlp2"], params["b_mlp2"],
        logical_hidden=logical_hidden)

    # --- concat along sequence dim + shared fc head (run once, padded N) ---
    combined = jnp.concatenate([image_features[:, None, :], text_features], axis=1)
    flat = combined.reshape(bsz * (t + 1), hp)
    out = pallas_matmul_bias(flat, params["fc_w"], params["fc_b"])
    return out.reshape(bsz, t + 1, -1)


if __name__ == "__main__":
    B, C, S = 2, 3, 16          # batch, image channels, spatial
    PATCH = 8                   # -> 4 patches of dim 3*8*8 = 192
    T, VOCAB = 8, 50            # text seq length, vocab size
    HIDDEN, MLP = 32, 64
    NUM_CLASSES = 10

    key = jax.random.PRNGKey(0)
    k_img, k_txt, k_par = jax.random.split(key, 3)

    image = jax.random.normal(k_img, (B, C, S, S), dtype=jnp.float32)   # NCHW
    text = jax.random.randint(k_txt, (B, T), 0, VOCAB, dtype=jnp.int32)

    params = init_params(k_par, patch_dim=C * PATCH * PATCH, hidden=HIDDEN,
                         vocab=VOCAB, max_t=T, mlp=MLP, num_classes=NUM_CLASSES)

    fwd = jax.jit(functools.partial(calligraphy_forward, patch=PATCH,
                                    logical_hidden=HIDDEN))
    out = jax.block_until_ready(fwd(params, image, text))
    assert out.shape == (B, T + 1, NUM_CLASSES), out.shape
    assert bool(jnp.all(jnp.isfinite(out)))
    print("KERNEL_OK")
</pallas_src>

<mosaic_0001>
module attributes {stable_mosaic.version = 11 : i64} {
  func.func @_gpt_block_kernel(%arg0: i32, %arg1: memref<1x8x128xf32, #tpu.memory_space<vmem>>, %arg2: memref<128x384xbf16, #tpu.memory_space<vmem>>, %arg3: memref<1x384xf32, #tpu.memory_space<vmem>>, %arg4: memref<128x128xbf16, #tpu.memory_space<vmem>>, %arg5: memref<1x128xf32, #tpu.memory_space<vmem>>, %arg6: memref<128x128xbf16, #tpu.memory_space<vmem>>, %arg7: memref<1x128xf32, #tpu.memory_space<vmem>>, %arg8: memref<128x128xbf16, #tpu.memory_space<vmem>>, %arg9: memref<1x128xf32, #tpu.memory_space<vmem>>, %arg10: memref<1x8x128xf32, #tpu.memory_space<vmem>>) attributes {dimension_semantics = [#tpu.dimension_semantics<parallel>], iteration_bounds = array<i64: 2>, scalar_prefetch = 0 : i64, scratch_operands = 0 : i64, tpu.core_type = #tpu.core_type<tc>, window_params = [{transform_indices = @transform_0, window_bounds = array<i64: 1, 8, 128>}, {pipeline_mode = #tpu.pipeline_mode<synchronous>, transform_indices = @transform_1, window_bounds = array<i64: 128, 384>}, {pipeline_mode = #tpu.pipeline_mode<synchronous>, transform_indices = @transform_2, window_bounds = array<i64: 1, 384>}, {pipeline_mode = #tpu.pipeline_mode<synchronous>, transform_indices = @transform_3, window_bounds = array<i64: 128, 128>}, {pipeline_mode = #tpu.pipeline_mode<synchronous>, transform_indices = @transform_4, window_bounds = array<i64: 1, 128>}, {pipeline_mode = #tpu.pipeline_mode<synchronous>, transform_indices = @transform_5, window_bounds = array<i64: 128, 128>}, {pipeline_mode = #tpu.pipeline_mode<synchronous>, transform_indices = @transform_6, window_bounds = array<i64: 1, 128>}, {pipeline_mode = #tpu.pipeline_mode<synchronous>, transform_indices = @transform_7, window_bounds = array<i64: 128, 128>}, {pipeline_mode = #tpu.pipeline_mode<synchronous>, transform_indices = @transform_8, window_bounds = array<i64: 1, 128>}, {transform_indices = @transform_9, window_bounds = array<i64: 1, 8, 128>}]} {
    %c0 = arith.constant 0 : index
    %c0_0 = arith.constant 0 : index
    %c0_1 = arith.constant 0 : index
    %0 = vector.load %arg1[%c0, %c0_0, %c0_1] : memref<1x8x128xf32, #tpu.memory_space<vmem>>, vector<1x8x128xf32>
    %1 = vector.shape_cast %0 : vector<1x8x128xf32> to vector<8x128xf32>
    %2 = arith.truncf %1 : vector<8x128xf32> to vector<8x128xbf16>
    %c0_2 = arith.constant 0 : index
    %c0_3 = arith.constant 0 : index
    %3 = vector.load %arg2[%c0_2, %c0_3] : memref<128x384xbf16, #tpu.memory_space<vmem>>, vector<128x384xbf16>
    %cst = arith.constant dense<0.000000e+00> : vector<8x384xf32>
    %4 = tpu.matmul %2, %3, %cst {dimension_numbers = #tpu.dot_dimension_numbers<[1], [0], [0], [1], [0, 0, 1, 1], [], []>} : vector<8x128xbf16>, vector<128x384xbf16>, vector<8x384xf32> -> vector<8x384xf32>
    %c0_4 = arith.constant 0 : index
    %c0_5 = arith.constant 0 : index
    %5 = vector.load %arg3[%c0_4, %c0_5] : memref<1x384xf32, #tpu.memory_space<vmem>>, vector<1x384xf32>
    %6 = vector.broadcast %5 : vector<1x384xf32> to vector<8x384xf32>
    %7 = arith.addf %4, %6 : vector<8x384xf32>
    %8 = vector.extract_strided_slice %7 {offsets = [0, 0], sizes = [8, 128], strides = [1, 1]} : vector<8x384xf32> to vector<8x128xf32>
    %9 = vector.extract_strided_slice %7 {offsets = [0, 128], sizes = [8, 128], strides = [1, 1]} : vector<8x384xf32> to vector<8x128xf32>
    %10 = vector.extract_strided_slice %7 {offsets = [0, 256], sizes = [8, 128], strides = [1, 1]} : vector<8x384xf32> to vector<8x128xf32>
    %11 = arith.truncf %8 : vector<8x128xf32> to vector<8x128xbf16>
    %12 = arith.truncf %9 : vector<8x128xf32> to vector<8x128xbf16>
    %cst_6 = arith.constant dense<0.000000e+00> : vector<8x8xf32>
    %13 = tpu.matmul %11, %12, %cst_6 {dimension_numbers = #tpu.dot_dimension_numbers<[1], [1], [0], [0], [0, 0, 1, 0], [], []>} : vector<8x128xbf16>, vector<8x128xbf16>, vector<8x8xf32> -> vector<8x8xf32>
    %cst_7 = arith.constant 0.176776692 : f32
    %14 = vector.broadcast %cst_7 : f32 to vector<8x8xf32>
    %15 = arith.mulf %13, %14 : vector<8x8xf32>
    %16 = tpu.iota {dimensions = array<i32: 0>} : vector<8x8xi32>
    %17 = tpu.iota {dimensions = array<i32: 1>} : vector<8x8xi32>
    %18 = arith.cmpi sle, %17, %16 : vector<8x8xi32>
    %cst_8 = arith.constant -1.000000e+30 : f32
    %19 = vector.broadcast %cst_8 : f32 to vector<8x8xf32>
    %20 = arith.select %18, %15, %19 : vector<8x8xi1>, vector<8x8xf32>
    %cst_9 = arith.constant dense<0xFF800000> : vector<8xf32>
    %21 = vector.multi_reduction <maximumf>, %20, %cst_9 [1] : vector<8x8xf32> to vector<8xf32>
    %22 = vector.shape_cast %21 : vector<8xf32> to vector<8x1xf32>
    %23 = vector.broadcast %22 : vector<8x1xf32> to vector<8x8xf32>
    %24 = arith.subf %20, %23 : vector<8x8xf32>
    %25 = math.exp %24 : vector<8x8xf32>
    %cst_10 = arith.constant dense<0.000000e+00> : vector<8xf32>
    %26 = vector.multi_reduction <add>, %25, %cst_10 [1] : vector<8x8xf32> to vector<8xf32>
    %27 = vector.shape_cast %26 : vector<8xf32> to vector<8x1xf32>
    %28 = tpu.reciprocal %27 {approx = true} : vector<8x1xf32> -> vector<8x1xf32>
    %29 = vector.broadcast %28 : vector<8x1xf32> to vector<8x8xf32>
    %30 = arith.mulf %25, %29 : vector<8x8xf32>
    %31 = arith.truncf %30 : vector<8x8xf32> to vector<8x8xbf16>
    %32 = arith.truncf %10 : vector<8x128xf32> to vector<8x128xbf16>
    %cst_11 = arith.constant dense<0.000000e+00> : vector<8x128xf32>
    %33 = tpu.matmul %31, %32, %cst_11 {dimension_numbers = #tpu.dot_dimension_numbers<[1], [0], [0], [1], [0, 0, 1, 1], [], []>} : vector<8x8xbf16>, vector<8x128xbf16>, vector<8x128xf32> -> vector<8x128xf32>
    %34 = arith.truncf %33 : vector<8x128xf32> to vector<8x128xbf16>
    %c0_12 = arith.constant 0 : index
    %c0_13 = arith.constant 0 : index
    %35 = vector.load %arg4[%c0_12, %c0_13] : memref<128x128xbf16, #tpu.memory_space<vmem>>, vector<128x128xbf16>
    %cst_14 = arith.constant dense<0.000000e+00> : vector<8x128xf32>
    %36 = tpu.matmul %34, %35, %cst_14 {dimension_numbers = #tpu.dot_dimension_numbers<[1], [0], [0], [1], [0, 0, 1, 1], [], []>} : vector<8x128xbf16>, vector<128x128xbf16>, vector<8x128xf32> -> vector<8x128xf32>
    %37 = arith.addf %1, %36 : vector<8x128xf32>
    %c0_15 = arith.constant 0 : index
    %c0_16 = arith.constant 0 : index
    %38 = vector.load %arg5[%c0_15, %c0_16] : memref<1x128xf32, #tpu.memory_space<vmem>>, vector<1x128xf32>
    %39 = vector.broadcast %38 : vector<1x128xf32> to vector<8x128xf32>
    %40 = arith.addf %37, %39 : vector<8x128xf32>
    %41 = arith.truncf %40 : vector<8x128xf32> to vector<8x128xbf16>
    %c0_17 = arith.constant 0 : index
    %c0_18 = arith.constant 0 : index
    %42 = vector.load %arg6[%c0_17, %c0_18] : memref<128x128xbf16, #tpu.memory_space<vmem>>, vector<128x128xbf16>
    %cst_19 = arith.constant dense<0.000000e+00> : vector<8x128xf32>
    %43 = tpu.matmul %41, %42, %cst_19 {dimension_numbers = #tpu.dot_dimension_numbers<[1], [0], [0], [1], [0, 0, 1, 1], [], []>} : vector<8x128xbf16>, vector<128x128xbf16>, vector<8x128xf32> -> vector<8x128xf32>
    %c0_20 = arith.constant 0 : index
    %c0_21 = arith.constant 0 : index
    %44 = vector.load %arg7[%c0_20, %c0_21] : memref<1x128xf32, #tpu.memory_space<vmem>>, vector<1x128xf32>
    %45 = vector.broadcast %44 : vector<1x128xf32> to vector<8x128xf32>
    %46 = arith.addf %43, %45 : vector<8x128xf32>
    %47 = arith.mulf %46, %46 : vector<8x128xf32>
    %48 = arith.mulf %46, %47 : vector<8x128xf32>
    %cst_22 = arith.constant 4.471500e-02 : f32
    %49 = vector.broadcast %cst_22 : f32 to vector<8x128xf32>
    %50 = arith.mulf %49, %48 : vector<8x128xf32>
    %51 = arith.addf %46, %50 : vector<8x128xf32>
    %cst_23 = arith.constant 0.797884583 : f32
    %52 = vector.broadcast %cst_23 : f32 to vector<8x128xf32>
    %53 = arith.mulf %52, %51 : vector<8x128xf32>
    %54 = math.tanh %53 : vector<8x128xf32>
    %cst_24 = arith.constant 1.000000e+00 : f32
    %55 = vector.broadcast %cst_24 : f32 to vector<8x128xf32>
    %56 = arith.addf %55, %54 : vector<8x128xf32>
    %cst_25 = arith.constant 5.000000e-01 : f32
    %57 = vector.broadcast %cst_25 : f32 to vector<8x128xf32>
    %58 = arith.mulf %57, %56 : vector<8x128xf32>
    %59 = arith.mulf %46, %58 : vector<8x128xf32>
    %60 = arith.truncf %59 : vector<8x128xf32> to vector<8x128xbf16>
    %c0_26 = arith.constant 0 : index
    %c0_27 = arith.constant 0 : index
    %61 = vector.load %arg8[%c0_26, %c0_27] : memref<128x128xbf16, #tpu.memory_space<vmem>>, vector<128x128xbf16>
    %cst_28 = arith.constant dense<0.000000e+00> : vector<8x128xf32>
    %62 = tpu.matmul %60, %61, %cst_28 {dimension_numbers = #tpu.dot_dimension_numbers<[1], [0], [0], [1], [0, 0, 1, 1], [], []>} : vector<8x128xbf16>, vector<128x128xbf16>, vector<8x128xf32> -> vector<8x128xf32>
    %63 = arith.addf %40, %62 : vector<8x128xf32>
    %c0_29 = arith.constant 0 : index
    %c0_30 = arith.constant 0 : index
    %64 = vector.load %arg9[%c0_29, %c0_30] : memref<1x128xf32, #tpu.memory_space<vmem>>, vector<1x128xf32>
    %65 = vector.broadcast %64 : vector<1x128xf32> to vector<8x128xf32>
    %66 = arith.addf %63, %65 : vector<8x128xf32>
    %c0_31 = arith.constant 0 : index
    %c0_32 = arith.constant 0 : index
    %c0_33 = arith.constant 0 : index
    %67 = vector.load %arg10[%c0_31, %c0_32, %c0_33] : memref<1x8x128xf32, #tpu.memory_space<vmem>>, vector<1x8x128xf32>
    %68 = vector.shape_cast %67 : vector<1x8x128xf32> to vector<8x128xf32>
    %69 = vector.shape_cast %66 : vector<8x128xf32> to vector<1x8x128xf32>
    tpu.vector_store %arg10[%c0_31, %c0_32, %c0_33], %69 {strides = array<i32>} : memref<1x8x128xf32, #tpu.memory_space<vmem>>, vector<1x8x128xf32>,
    return
  }
  func.func @transform_0(%arg0: i32) -> (i32, i32, i32) {
    %c0_i32 = arith.constant 0 : i32
    %c0_i32_0 = arith.constant 0 : i32
    %c0_i32_1 = arith.constant 0 : i32
    return %arg0, %c0_i32, %c0_i32_0 : i32, i32, i32
  }
  func.func @transform_1(%arg0: i32) -> (i32, i32) {
    %c0_i32 = arith.constant 0 : i32
    %c0_i32_0 = arith.constant 0 : i32
    %c0_i32_1 = arith.constant 0 : i32
    return %c0_i32, %c0_i32_0 : i32, i32
  }
  func.func @transform_2(%arg0: i32) -> (i32, i32) {
    %c0_i32 = arith.constant 0 : i32
    %c0_i32_0 = arith.constant 0 : i32
    %c0_i32_1 = arith.constant 0 : i32
    return %c0_i32, %c0_i32_0 : i32, i32
  }
  func.func @transform_3(%arg0: i32) -> (i32, i32) {
    %c0_i32 = arith.constant 0 : i32
    %c0_i32_0 = arith.constant 0 : i32
    %c0_i32_1 = arith.constant 0 : i32
    return %c0_i32, %c0_i32_0 : i32, i32
  }
  func.func @transform_4(%arg0: i32) -> (i32, i32) {
    %c0_i32 = arith.constant 0 : i32
    %c0_i32_0 = arith.constant 0 : i32
    %c0_i32_1 = arith.constant 0 : i32
    return %c0_i32, %c0_i32_0 : i32, i32
  }
  func.func @transform_5(%arg0: i32) -> (i32, i32) {
    %c0_i32 = arith.constant 0 : i32
    %c0_i32_0 = arith.constant 0 : i32
    %c0_i32_1 = arith.constant 0 : i32
    return %c0_i32, %c0_i32_0 : i32, i32
  }
  func.func @transform_6(%arg0: i32) -> (i32, i32) {
    %c0_i32 = arith.constant 0 : i32
    %c0_i32_0 = arith.constant 0 : i32
    %c0_i32_1 = arith.constant 0 : i32
    return %c0_i32, %c0_i32_0 : i32, i32
  }
  func.func @transform_7(%arg0: i32) -> (i32, i32) {
    %c0_i32 = arith.constant 0 : i32
    %c0_i32_0 = arith.constant 0 : i32
    %c0_i32_1 = arith.constant 0 : i32
    return %c0_i32, %c0_i32_0 : i32, i32
  }
  func.func @transform_8(%arg0: i32) -> (i32, i32) {
    %c0_i32 = arith.constant 0 : i32
    %c0_i32_0 = arith.constant 0 : i32
    %c0_i32_1 = arith.constant 0 : i32
    return %c0_i32, %c0_i32_0 : i32, i32
  }
  func.func @transform_9(%arg0: i32) -> (i32, i32, i32) {
    %c0_i32 = arith.constant 0 : i32
    %c0_i32_0 = arith.constant 0 : i32
    %c0_i32_1 = arith.constant 0 : i32
    return %arg0, %c0_i32, %c0_i32_0 : i32, i32, i32
  }
}

module attributes {stable_mosaic.version = 11 : i64} {
  func.func @_vit_branch_kernel(%arg0: memref<8x256xbf16, #tpu.memory_space<vmem>>, %arg1: memref<256x128xbf16, #tpu.memory_space<vmem>>, %arg2: memref<1x128xf32, #tpu.memory_space<vmem>>, %arg3: memref<2x8xbf16, #tpu.memory_space<vmem>>, %arg4: memref<128x128xbf16, #tpu.memory_space<vmem>>, %arg5: memref<1x128xf32, #tpu.memory_space<vmem>>, %arg6: memref<2x128xf32, #tpu.memory_space<vmem>>) attributes {dimension_semantics = [], scalar_prefetch = 0 : i64, scratch_operands = 0 : i64, tpu.core_type = #tpu.core_type<tc>} {
    %c0 = arith.constant 0 : index
    %c0_0 = arith.constant 0 : index
    %0 = vector.load %arg0[%c0, %c0_0] : memref<8x256xbf16, #tpu.memory_space<vmem>>, vector<8x256xbf16>
    %c0_1 = arith.constant 0 : index
    %c0_2 = arith.constant 0 : index
    %1 = vector.load %arg1[%c0_1, %c0_2] : memref<256x128xbf16, #tpu.memory_space<vmem>>, vector<256x128xbf16>
    %cst = arith.constant dense<0.000000e+00> : vector<8x128xf32>
    %2 = tpu.matmul %0, %1, %cst {dimension_numbers = #tpu.dot_dimension_numbers<[1], [0], [0], [1], [0, 0, 1, 1], [], []>} : vector<8x256xbf16>, vector<256x128xbf16>, vector<8x128xf32> -> vector<8x128xf32>
    %c0_3 = arith.constant 0 : index
    %c0_4 = arith.constant 0 : index
    %3 = vector.load %arg2[%c0_3, %c0_4] : memref<1x128xf32, #tpu.memory_space<vmem>>, vector<1x128xf32>
    %4 = vector.broadcast %3 : vector<1x128xf32> to vector<8x128xf32>
    %5 = arith.addf %2, %4 : vector<8x128xf32>
    %6 = arith.mulf %5, %5 : vector<8x128xf32>
    %7 = arith.mulf %5, %6 : vector<8x128xf32>
    %cst_5 = arith.constant 4.471500e-02 : f32
    %8 = vector.broadcast %cst_5 : f32 to vector<8x128xf32>
    %9 = arith.mulf %8, %7 : vector<8x128xf32>
    %10 = arith.addf %5, %9 : vector<8x128xf32>
    %cst_6 = arith.constant 0.797884583 : f32
    %11 = vector.broadcast %cst_6 : f32 to vector<8x128xf32>
    %12 = arith.mulf %11, %10 : vector<8x128xf32>
    %13 = math.tanh %12 : vector<8x128xf32>
    %cst_7 = arith.constant 1.000000e+00 : f32
    %14 = vector.broadcast %cst_7 : f32 to vector<8x128xf32>
    %15 = arith.addf %14, %13 : vector<8x128xf32>
    %cst_8 = arith.constant 5.000000e-01 : f32
    %16 = vector.broadcast %cst_8 : f32 to vector<8x128xf32>
    %17 = arith.mulf %16, %15 : vector<8x128xf32>
    %18 = arith.mulf %5, %17 : vector<8x128xf32>
    %c0_9 = arith.constant 0 : index
    %c0_10 = arith.constant 0 : index
    %19 = vector.load %arg3[%c0_9, %c0_10] : memref<2x8xbf16, #tpu.memory_space<vmem>>, vector<2x8xbf16>
    %20 = arith.truncf %18 : vector<8x128xf32> to vector<8x128xbf16>
    %cst_11 = arith.constant dense<0.000000e+00> : vector<2x128xf32>
    %21 = tpu.matmul %19, %20, %cst_11 {dimension_numbers = #tpu.dot_dimension_numbers<[1], [0], [0], [1], [0, 0, 1, 1], [], []>} : vector<2x8xbf16>, vector<8x128xbf16>, vector<2x128xf32> -> vector<2x128xf32>
    %22 = arith.truncf %21 : vector<2x128xf32> to vector<2x128xbf16>
    %c0_12 = arith.constant 0 : index
    %c0_13 = arith.constant 0 : index
    %23 = vector.load %arg4[%c0_12, %c0_13] : memref<128x128xbf16, #tpu.memory_space<vmem>>, vector<128x128xbf16>
    %cst_14 = arith.constant dense<0.000000e+00> : vector<2x128xf32>
    %24 = tpu.matmul %22, %23, %cst_14 {dimension_numbers = #tpu.dot_dimension_numbers<[1], [0], [0], [1], [0, 0, 1, 1], [], []>} : vector<2x128xbf16>, vector<128x128xbf16>, vector<2x128xf32> -> vector<2x128xf32>
    %c0_15 = arith.constant 0 : index
    %c0_16 = arith.constant 0 : index
    %25 = vector.load %arg5[%c0_15, %c0_16] : memref<1x128xf32, #tpu.memory_space<vmem>>, vector<1x128xf32>
    %26 = vector.broadcast %25 : vector<1x128xf32> to vector<2x128xf32>
    %27 = arith.addf %24, %26 : vector<2x128xf32>
    %c0_17 = arith.constant 0 : index
    %c0_18 = arith.constant 0 : index
    %28 = vector.load %arg6[%c0_17, %c0_18] : memref<2x128xf32, #tpu.memory_space<vmem>>, vector<2x128xf32>
    tpu.vector_store %arg6[%c0_17, %c0_18], %27 {strides = array<i32>} : memref<2x128xf32, #tpu.memory_space<vmem>>, vector<2x128xf32>,
    return
  }
}

module attributes {stable_mosaic.version = 11 : i64} {
  func.func @_matmul_bias_kernel(%arg0: i32, %arg1: i32, %arg2: i32, %arg3: memref<24x128xbf16, #tpu.memory_space<vmem>>, %arg4: memref<128x128xbf16, #tpu.memory_space<vmem>>, %arg5: memref<1x128xf32, #tpu.memory_space<vmem>>, %arg6: memref<24x128xf32, #tpu.memory_space<vmem>>, %arg7: memref<24x128xf32, #tpu.memory_space<vmem>>) attributes {dimension_semantics = [#tpu.dimension_semantics<parallel>, #tpu.dimension_semantics<parallel>, #tpu.dimension_semantics<arbitrary>], iteration_bounds = array<i64: 1, 1, 1>, scalar_prefetch = 0 : i64, scratch_operands = 1 : i64, tpu.core_type = #tpu.core_type<tc>, window_params = [{transform_indices = @transform_0, window_bounds = array<i64: 24, 128>}, {transform_indices = @transform_1, window_bounds = array<i64: 128, 128>}, {transform_indices = @transform_2, window_bounds = array<i64: 1, 128>}, {transform_indices = @transform_3, window_bounds = array<i64: 24, 128>}]} {
    %c0_i32 = arith.constant 0 : i32
    %0 = arith.cmpi eq, %arg2, %c0_i32 : i32
    %1 = arith.extui %0 : i1 to i32
    %c0_i32_0 = arith.constant 0 : i32
    %2 = arith.cmpi ne, %1, %c0_i32_0 : i32
    scf.if %2 {
      %cst_10 = arith.constant 0.000000e+00 : f32
      %12 = vector.broadcast %cst_10 : f32 to vector<24x128xf32>
      %c0_11 = arith.constant 0 : index
      %c0_12 = arith.constant 0 : index
      %13 = vector.load %arg7[%c0_11, %c0_12] : memref<24x128xf32, #tpu.memory_space<vmem>>, vector<24x128xf32>
      tpu.vector_store %arg7[%c0_11, %c0_12], %12 {strides = array<i32>} : memref<24x128xf32, #tpu.memory_space<vmem>>, vector<24x128xf32>,
    } else {
    }
    %c0 = arith.constant 0 : index
    %c0_1 = arith.constant 0 : index
    %3 = vector.load %arg7[%c0, %c0_1] : memref<24x128xf32, #tpu.memory_space<vmem>>, vector<24x128xf32>
    %c0_2 = arith.constant 0 : index
    %c0_3 = arith.constant 0 : index
    %4 = vector.load %arg3[%c0_2, %c0_3] : memref<24x128xbf16, #tpu.memory_space<vmem>>, vector<24x128xbf16>
    %c0_4 = arith.constant 0 : index
    %c0_5 = arith.constant 0 : index
    %5 = vector.load %arg4[%c0_4, %c0_5] : memref<128x128xbf16, #tpu.memory_space<vmem>>, vector<128x128xbf16>
    %cst = arith.constant dense<0.000000e+00> : vector<24x128xf32>
    %6 = tpu.matmul %4, %5, %cst {dimension_numbers = #tpu.dot_dimension_numbers<[1], [0], [0], [1], [0, 0, 1, 1], [], []>} : vector<24x128xbf16>, vector<128x128xbf16>, vector<24x128xf32> -> vector<24x128xf32>
    %7 = arith.addf %3, %6 : vector<24x128xf32>
    %c0_6 = arith.constant 0 : index
    %c0_7 = arith.constant 0 : index
    %8 = vector.load %arg7[%c0_6, %c0_7] : memref<24x128xf32, #tpu.memory_space<vmem>>, vector<24x128xf32>
    tpu.vector_store %arg7[%c0_6, %c0_7], %7 {strides = array<i32>} : memref<24x128xf32, #tpu.memory_space<vmem>>, vector<24x128xf32>,
    %c0_i32_8 = arith.constant 0 : i32
    %9 = arith.cmpi eq, %arg2, %c0_i32_8 : i32
    %10 = arith.extui %9 : i1 to i32
    %c0_i32_9 = arith.constant 0 : i32
    %11 = arith.cmpi ne, %10, %c0_i32_9 : i32
    scf.if %11 {
      %c0_10 = arith.constant 0 : index
      %c0_11 = arith.constant 0 : index
      %12 = vector.load %arg7[%c0_10, %c0_11] : memref<24x128xf32, #tpu.memory_space<vmem>>, vector<24x128xf32>
      %c0_12 = arith.constant 0 : index
      %c0_13 = arith.constant 0 : index
      %13 = vector.load %arg5[%c0_12, %c0_13] : memref<1x128xf32, #tpu.memory_space<vmem>>, vector<1x128xf32>
      %14 = vector.broadcast %13 : vector<1x128xf32> to vector<24x128xf32>
      %15 = arith.addf %12, %14 : vector<24x128xf32>
      %c0_14 = arith.constant 0 : index
      %c0_15 = arith.constant 0 : index
      %16 = vector.load %arg6[%c0_14, %c0_15] : memref<24x128xf32, #tpu.memory_space<vmem>>, vector<24x128xf32>
      tpu.vector_store %arg6[%c0_14, %c0_15], %15 {strides = array<i32>} : memref<24x128xf32, #tpu.memory_space<vmem>>, vector<24x128xf32>,
    } else {
    }
    return
  }
  func.func @transform_0(%arg0: i32, %arg1: i32, %arg2: i32) -> (i32, i32) {
    %c0_i32 = arith.constant 0 : i32
    return %arg0, %arg2 : i32, i32
  }
  func.func @transform_1(%arg0: i32, %arg1: i32, %arg2: i32) -> (i32, i32) {
    %c0_i32 = arith.constant 0 : i32
    return %arg2, %arg1 : i32, i32
  }
  func.func @transform_2(%arg0: i32, %arg1: i32, %arg2: i32) -> (i32, i32) {
    %c0_i32 = arith.constant 0 : i32
    %c0_i32_0 = arith.constant 0 : i32
    return %c0_i32, %arg1 : i32, i32
  }
  func.func @transform_3(%arg0: i32, %arg1: i32, %arg2: i32) -> (i32, i32) {
    %c0_i32 = arith.constant 0 : i32
    return %arg0, %arg1 : i32, i32
  }
}

</mosaic_0001>

<bundles_post_ra>
// kernel: calligraphy_forward.5
= control target key start
LH: loop header
LB: loop body
LE: loop exit
PB: predicated region body
PF: predicated region fallthrough
CT: control target
= control target key end

     0   :  { %s292_s1 = inlined_call_operand.vmem [shape: bf16[128,128], index: 1, kind: input, shape index: {}]   ;;  %s293_s0 = inlined_call_operand.vmem [shape: bf16[24,128], index: 0, kind: input, shape index: {}]   ;;  %s294_s2 = inlined_call_operand.vmem [shape: f32[1,128], index: 2, kind: input, shape index: {}]   ;;  %s295_s3 = inlined_call_operand.vmem [shape: f32[24,128], index: 3, kind: output, shape index: {}]  }
   0x1   :  { %v220_v0 = vld [vmem:[%s292_s1 + $0x38] sm:$0xff]   ;;  %v221_v1 = vld [vmem:[%s292_s1 + $0x30] sm:$0xff]   ;;  %v222_v2 = vld [vmem:[%s292_s1 + $0x28] sm:$0xff]  }
   0x2   :  { %200 = vmatprep.subr.bf16.mxu0 %v220_v0  ;;  %v223_v3 = vld [vmem:[%s292_s1 + $0x20] sm:$0xff]   ;;  %v224_v5 = vld [vmem:[%s292_s1 + $0x18] sm:$0xff]   ;;  %v225_v6 = vld [vmem:[%s292_s1 + $0x10] sm:$0xff]  }
   0x3   :  { %201 = vmatpush3.bf16.msra.mxu0 %v220_v0  ;;  %v228_v4 = vld [vmem:[%s293_s0] sm:$0xff]   ;;  %v226_v7 = vld [vmem:[%s292_s1 + $0x8] sm:$0xff]  }
   0x4   :  { %202 = vmatprep.subr.bf16.mxu0 %v221_v1  ;;  %216 = vmatprep.mubr.bf16.mxu0 %v228_v4  ;;  %v227_v8 = vld [vmem:[%s292_s1] sm:$0xff]   ;;  %v229_v9 = vld [vmem:[%s293_s0 + $0x8] ss:$0 sps:$4 sm:$0xff]  }
   0x5   :  { %v189_v10 = vld [vmem:[%s294_s2] ss:$0 sm:$0xff] }
   0x7   :  { %203 = vmatpush3.bf16.msra.mxu0 %v221_v1 }
   0x8   :  { %204 = vmatprep.subr.bf16.mxu0 %v222_v2 }
   0xb   :  { %205 = vmatpush3.bf16.msra.mxu0 %v222_v2 }
   0xc   :  { %206 = vmatprep.subr.bf16.mxu0 %v223_v3 }
   0xf   :  { %207 = vmatpush3.bf16.msra.mxu0 %v223_v3 }
  0x10   :  { %208 = vmatprep.subr.bf16.mxu0 %v224_v5 }
  0x13   :  { %209 = vmatpush3.bf16.msra.mxu0 %v224_v5 }
  0x14   :  { %210 = vmatprep.subr.bf16.mxu0 %v225_v6 }
  0x17   :  { %211 = vmatpush3.bf16.msra.mxu0 %v225_v6 }
  0x18   :  { %212 = vmatprep.subr.bf16.mxu0 %v226_v7 }
  0x1b   :  { %213 = vmatpush3.bf16.msra.mxu0 %v226_v7 }
  0x1c   :  { %214 = vmatprep.subr.bf16.mxu0 %v227_v8 }
  0x1f   :  { %215 = vmatpush3.bf16.msra.mxu0 %v227_v8 }
  0x22   :  { %217 = vmatmul.mubr.bf16.vlgmr.msra.gmra.mxu0 %v229_v9 }
  0xe2   :  { %v218_v11 = vpop.f32.mrf.mxu0 }
  0xe3   :  { %v171_v12 = vadd.f32 %v218_v11, %v189_v10 }
  0xe4   :  { %v136_v13 = vpop.f32.mrf.mxu0 }
  0xe5   :  { %174 = vst [vmem:[%s295_s3 + $0x10] sm:$0xff] %v171_v12  ;;  %v169_v14 = vadd.f32 %v189_v10, %v136_v13 }
  0xe6   :  { %v219_v15 = vpop.f32.mrf.mxu0 }
  0xe7   :  { %172 = vst [vmem:[%s295_s3] sm:$0xff] %v169_v14 }
  0xe8   :  { %v139_v16 = vpop.f32.mrf.mxu0 }
  0xe9   :  { %v170_v17 = vadd.f32 %v189_v10, %v139_v16 }
  0xeb   :  { %173 = vst [vmem:[%s295_s3 + $0x8] sm:$0xff] %v170_v17 }

// kernel: calligraphy_forward.3
= control target key start
LH: loop header
LB: loop body
LE: loop exit
PB: predicated region body
PF: predicated region fallthrough
CT: control target
= control target key end

     0   :  { %v501_v19 = vmov 0.0   ;;  %vm502_vm0 = vmmov 0   ;;  %vm222_vm1 = vcmask 1043456   ;;  %vm218_vm2 = vcmask 64512   ;;  %s627_s1 = inlined_call_operand.vmem [shape: bf16[256,128], index: 1, kind: input, shape index: {}]   ;;  %s628_s0 = inlined_call_operand.vmem [shape: bf16[8,256], index: 0, kind: input, shape index: {}]   ;;  %s629_s4 = inlined_call_operand.vmem [shape: bf16[128,128], index: 4, kind: input, shape index: {}]   ;;  %s630_s2 = inlined_call_operand.vmem [shape: f32[1,128], index: 2, kind: input, shape index: {}]   ;;  %s631_s3 = inlined_call_operand.vmem [shape: bf16[2,8], index: 3, kind: input, shape index: {}]   ;;  %s632_s5 = inlined_call_operand.vmem [shape: f32[1,128], index: 5, kind: input, shape index: {}]   ;;  %s633_s6 = inlined_call_operand.vmem [shape: f32[2,128], index: 6, kind: output, shape index: {}]  }
   0x1   :  { %v473_v0 = vld [vmem:[%s627_s1 + $0x78] sm:$0xff]   ;;  %v475_v2 = vld [vmem:[%s627_s1 + $0x70] sm:$0xff]   ;;  %v477_v4 = vld [vmem:[%s627_s1 + $0x68] sm:$0xff]   ;;  %445 = vmatprep.subr.bf16.mxu1 %v501_v19  ;;  %447 = vmatprep.mubr.msk.bf16.mxu1 %vm502_vm0, %v501_v19 }
   0x2   :  { %v474_v1 = vld [vmem:[%s627_s1 + $0x38] sm:$0xff]   ;;  %412 = vmatprep.subr.bf16.mxu0 %v473_v0  ;;  %v476_v3 = vld [vmem:[%s627_s1 + $0x30] sm:$0xff]   ;;  %v478_v5 = vld [vmem:[%s627_s1 + $0x28] sm:$0xff]  }
   0x3   :  { %413 = vmatpush3.bf16.msra.mxu0 %v474_v1  ;;  %v479_v6 = vld [vmem:[%s627_s1 + $0x60] sm:$0xff]   ;;  %v481_v8 = vld [vmem:[%s627_s1 + $0x58] sm:$0xff]   ;;  %v483_v10 = vld [vmem:[%s627_s1 + $0x50] sm:$0xff]  }
   0x4   :  { %414 = vmatprep.subr.bf16.mxu0 %v475_v2  ;;  %v480_v7 = vld [vmem:[%s627_s1 + $0x20] sm:$0xff]   ;;  %v482_v9 = vld [vmem:[%s627_s1 + $0x18] sm:$0xff]   ;;  %v484_v13 = vld [vmem:[%s627_s1 + $0x10] sm:$0xff]  }
   0x5   :  { %v24_v11 = vld [vmem:[%s628_s0] sm:$0xff]  ;;  %v485_v14 = vld [vmem:[%s627_s1 + $0x48] sm:$0xff]   ;;  %v491_v39 = vld [vmem:[%s629_s4 + $0x38] sm:$0xff]  }
   0x6   :  { %v385_v12 = vcombine.high %v24_v11, %v24_v11  ;;  %v486_v15 = vld [vmem:[%s627_s1 + $0x8] sm:$0xff]   ;;  %v487_v16 = vld [vmem:[%s627_s1 + $0x40] sm:$0xff]   ;;  %v384_v18 = vcombine.low %v24_v11, %v24_v11  ;;  %v492_v40 = vld [vmem:[%s629_s4 + $0x30] sm:$0xff]  }
   0x7   :  { %415 = vmatpush3.bf16.msra.mxu0 %v476_v3  ;;  %v488_v17 = vld [vmem:[%s627_s1] sm:$0xff]   ;;  %v493_v41 = vld [vmem:[%s629_s4 + $0x28] sm:$0xff]   ;;  %v495_v43 = vld [vmem:[%s629_s4 + $0x18] sm:$0xff]  }
   0x8   :  { %416 = vmatprep.subr.bf16.mxu0 %v477_v4  ;;  %199 = vmatprep.mubr.bf16.mxu0 %v385_v12  ;;  %v383_v21 = vld [vmem:[%s630_s2] ss:$0 sm:$0xff]  ;;  %v496_v44 = vld [vmem:[%s629_s4 + $0x10] sm:$0xff]   ;;  %v497_v45 = vld [vmem:[%s629_s4 + $0x8] sm:$0xff]  }
   0x9   :  { %v216_v38 = vld [vmem:[%s631_s3] sm:$0x1] }
   0xa   :  { %v494_v42 = vld [vmem:[%s629_s4 + $0x20] sm:$0xff]  }
   0xb   :  { %417 = vmatpush3.bf16.msra.mxu0 %v478_v5  ;;  %v498_v46 = vld [vmem:[%s629_s4] sm:$0xff]  }
   0xc   :  { %418 = vmatprep.subr.bf16.mxu0 %v479_v6  ;;  %v403_v52 = vld [vmem:[%s632_s5] ss:$0 sm:$0xff] }
   0xf   :  { %419 = vmatpush3.bf16.msra.mxu0 %v480_v7 }
  0x10   :  { %420 = vmatprep.subr.bf16.mxu0 %v481_v8 }
  0x13   :  { %421 = vmatpush3.bf16.msra.mxu0 %v482_v9 }
  0x14   :  { %422 = vmatprep.subr.bf16.mxu0 %v483_v10 }
  0x17   :  { %423 = vmatpush3.bf16.msra.mxu0 %v484_v13 }
  0x18   :  { %424 = vmatprep.subr.bf16.mxu0 %v485_v14 }
  0x1b   :  { %425 = vmatpush3.bf16.msra.mxu0 %v486_v15 }
  0x1c   :  { %426 = vmatprep.subr.bf16.mxu0 %v487_v16 }
  0x1f   :  { %427 = vmatpush3.bf16.msra.mxu0 %v488_v17 }
  0x22   :  { %200 = vmatmul.mubr.bf16.vlgmr.msra.gmra.mxu0 %v384_v18 }
  0xe2   :  { %v428_v20 = vpop.f32.mrf.mxu0 }
  0xe4   :  { %v429_v22 = vpop.f32.mrf.mxu0 }
  0xe5   :  { %v430_v23 = vadd.f32 %v429_v22, %v428_v20 }
  0xe6   :  { %v431_v24 = vpop.f32.mrf.mxu0 }
  0xe7   :  { %v202_v25 = vadd.f32 %v430_v23, %v383_v21 }
  0xe8   :  { %v432_v26 = vpop.f32.mrf.mxu0 }
  0xe9   :  { %v207_v27 = vmul.f32 %v202_v25, %v202_v25 }
  0xeb   :  { %v208_v28 = vmul.f32 %v207_v27, %v202_v25 }
  0xed   :  { %v209_v29 = vmul.f32 0.044715, %v208_v28 }
  0xef   :  { %v210_v30 = vadd.f32 %v209_v29, %v202_v25 }
  0xf1   :  { %v211_v31 = vmul.f32 0.7978846, %v210_v30 }
  0xf3   :  { %499 = vtanh.f32 %v211_v31 }
 0x100   :  { %v500_v32 = vpop.eup %499 }
 0x101   :  { %v213_v33 = vadd.f32 1.0, %v500_v32 }
 0x103   :  { %v214_v34 = vmul.f32 0.5, %v213_v33 }
 0x105   :  { %v215_v35 = vmul.f32 %v214_v34, %v202_v25 }
 0x107   :  { %v217_v36 = vpack.c.bf16 %v215_v35, %v215_v35 }
 0x109   :  { %v224_v37 = vsel %vm222_vm1, %v217_v36, 0 }
 0x10a   :  { %446 = vmatpush3.bf16.msra.mxu1 %v224_v37 }
 0x10b   :  { %451 = vmatprep.subr.bf16.mxu1 %v501_v19 }
 0x10d   :  { %448 = vmatmul.mubr.msk.bf16.vlgmr.msra.gmra.mxu1 %vm218_vm2, %v216_v38 }
 0x10e   :  { %452 = vmatpush3.bf16.msra.mxu1 %v491_v39  ;;  %467 = vmatprep.mubr.msk.bf16.mxu1 %vm502_vm0, %v501_v19 }
 0x10f   :  { %453 = vmatprep.subr.bf16.mxu1 %v501_v19 }
 0x112   :  { %454 = vmatpush3.bf16.msra.mxu1 %v492_v40 }
 0x113   :  { %455 = vmatprep.subr.bf16.mxu1 %v501_v19 }
 0x116   :  { %456 = vmatpush3.bf16.msra.mxu1 %v493_v41 }
 0x117   :  { %457 = vmatprep.subr.bf16.mxu1 %v501_v19 }
 0x11a   :  { %458 = vmatpush3.bf16.msra.mxu1 %v494_v42 }
 0x11b   :  { %459 = vmatprep.subr.bf16.mxu1 %v501_v19 }
 0x11e   :  { %460 = vmatpush3.bf16.msra.mxu1 %v495_v43 }
 0x11f   :  { %461 = vmatprep.subr.bf16.mxu1 %v501_v19 }
 0x122   :  { %462 = vmatpush3.bf16.msra.mxu1 %v496_v44 }
 0x123   :  { %463 = vmatprep.subr.bf16.mxu1 %v501_v19 }
 0x126   :  { %464 = vmatpush3.bf16.msra.mxu1 %v497_v45 }
 0x127   :  { %465 = vmatprep.subr.bf16.mxu1 %v501_v19 }
 0x12a   :  { %466 = vmatpush3.bf16.msra.mxu1 %v498_v46 }
 0x1cd   :  { %v260_v47 = vpop.f32.mrf.mxu1 }
 0x1ce   :  { %v266_v48 = vpack.c.bf16 %v260_v47, %v260_v47 }
 0x1cf   :  { %v449_v49 = vpop.f32.mrf.mxu1 }
 0x1d0   :  { %468 = vmatmul.mubr.bf16.vlgmr.msra.gmra.mxu1 %v266_v48 }
 0x1d1   :  { %v263_v50 = vpop.f32.mrf.mxu1 }
 0x1d3   :  { %v450_v51 = vpop.f32.mrf.mxu1 }
 0x290   :  { %v372_v53 = vpop.f32.mrf.mxu1 }
 0x291   :  { %v373_v54 = vadd.f32 %v403_v52, %v372_v53 }
 0x292   :  { %v469_v55 = vpop.f32.mrf.mxu1 }
 0x293   :  { %378 = vst [vmem:[%s633_s6] sm:$0x3] %v373_v54 }
 0x294   :  { %v375_v56 = vpop.f32.mrf.mxu1 }
 0x296   :  { %v470_v57 = vpop.f32.mrf.mxu1 }

// kernel: calligraphy_forward.4
= control target key start
LH: loop header
LB: loop body
LE: loop exit
PB: predicated region body
PF: predicated region fallthrough
CT: control target
= control target key end

     0   :  { %s1429_s30 = smov 0   ;;  %s1663_s0 = inlined_call_operand.vmem [shape: f32[2,8,128], index: 0, kind: input, shape index: {}]   ;;  %s1664_s1 = inlined_call_operand.vmem [shape: bf16[128,384], index: 1, kind: input, shape index: {}]   ;;  %s1665_s2 = inlined_call_operand.vmem [shape: f32[1,384], index: 2, kind: input, shape index: {}]   ;;  %s1666_s3 = inlined_call_operand.vmem [shape: bf16[128,128], index: 3, kind: input, shape index: {}]   ;;  %s1667_s4 = inlined_call_operand.vmem [shape: f32[1,128], index: 4, kind: input, shape index: {}]   ;;  %s1668_s5 = inlined_call_operand.vmem [shape: bf16[128,128], index: 5, kind: input, shape index: {}]   ;;  %s1669_s6 = inlined_call_operand.vmem [shape: f32[1,128], index: 6, kind: input, shape index: {}]   ;;  %s1670_s7 = inlined_call_operand.vmem [shape: bf16[128,128], index: 7, kind: input, shape index: {}]   ;;  %s1671_s8 = inlined_call_operand.vmem [shape: f32[1,128], index: 8, kind: input, shape index: {}]   ;;  %s1672_s9 = inlined_call_operand.vmem [shape: f32[2,8,128], index: 9, kind: output, shape index: {}]  }
   0x1 LB: > { %s1102_s10 = sadd.s32 4294967295, %s1374_s30   ;;  %p1106_p0 = scmp.ge.s32.totalorder %s1374_s30, 1  ;;  %s1374_s30 = sphi %s1429_s30, %s19_s30  }
   0x2   : > { %p286_p1 = scmp.lt.s32.totalorder %s1374_s30, 3 }
   0x4   : > { %p287_p2 = pnand %p1106_p0, %p286_p1 }
   0x5   : > { %p320_p3 = scmp.lt.s32.totalorder (!%p287_p2), %s1102_s10, 1 }
   0x6   : > { %290 = sbr.rel (%p287_p2) target bundleno = 1580 (0x62c), region = 56 }
   0xb   : > { %v1306_v0 = vld [vmem:[%s1664_s1 + $0xac] ss:$12 sps:$4 sm:$0xff]   ;;  %v1308_v1 = vld [vmem:[%s1664_s1 + $0xa8] ss:$12 sps:$4 sm:$0xff]   ;;  %v1376_v2 = vmov 0   ;;  %v1377_v4 = vmov 0.0   ;;  %v365_v28 = vlaneseq }
   0xc   : > { %540 = vmatprep.mubr.bf16.mxu0 %v1376_v2  ;;  %508 = vmatprep.subr.bf16.mxu0 %v1306_v0  ;;  %v1309_v3 = vld [vmem:[%s1664_s1 + $0x94] ss:$12 sps:$4 sm:$0xff]   ;;  %v1311_v5 = vld [vmem:[%s1664_s1 + $0x90] ss:$12 sps:$4 sm:$0xff]   ;;  %v1314_v7 = vld [vmem:[%s1664_s1 + $0x78] ss:$12 sps:$4 sm:$0xff]  }
   0xd   : > { %1203 = vmatprep.subr.bf16.mxu1 %v1377_v4  ;;  %509 = vmatpush1.bf16.msra.mxu0 %v1308_v1  ;;  %v1312_v6 = vld [vmem:[%s1664_s1 + $0x7c] ss:$12 sps:$4 sm:$0xff]   ;;  %v1315_v8 = vld [vmem:[%s1664_s1 + $0x64] ss:$12 sps:$4 sm:$0xff]   ;;  %v1317_v9 = vld [vmem:[%s1664_s1 + $0x60] ss:$12 sps:$4 sm:$0xff]  }
   0xe   : > { %510 = vmatprep.subr.bf16.mxu0 %v1309_v3  ;;  %s1674_s10 = smov (!%p320_p3, %s1102_s10), 1  ;;  %v1330_v10 = vld [vmem:[%s1664_s1 + $0xb0] ss:$12 sps:$4 sm:$0xff]   ;;  %v1318_v11 = vld [vmem:[%s1664_s1 + $0x4c] ss:$12 sps:$4 sm:$0xff]   ;;  %vm1378_vm0 = vmmov 0  }
   0xf   : > { %1204 = vmatpush3.bf16.msra.mxu1 %v1330_v10  ;;  %v1331_v12 = vld [vmem:[%s1664_s1 + $0x98] ss:$12 sps:$4 sm:$0xff]   ;;  %s1107_s14 = sshll.u32 %s1674_s10, 3  ;;  %v1320_v13 = vld [vmem:[%s1664_s1 + $0x48] ss:$12 sps:$4 sm:$0xff]   ;;  %1219 = vmatprep.mubr.msk.bf16.mxu1 %vm1378_vm0, %v1377_v4  ;;  %v366_v29 = vshrl.u32 %v365_v28, 7 }
  0x10   : > { %1205 = vmatprep.subr.bf16.mxu1 %v1377_v4  ;;  %v1321_v14 = vld [vmem:[%s1664_s1 + $0x34] ss:$12 sps:$4 sm:$0xff]   ;;  %v1323_v15 = vld [vmem:[%s1664_s1 + $0x30] ss:$12 sps:$4 sm:$0xff]   ;;  %v1326_v19 = vld [vmem:[%s1664_s1 + $0x18] ss:$12 sps:$4 sm:$0xff]   ;;  %s323_s15 = scalar_lea.vmem %s1663_s0, %s1107_s14  ;;  %s327_s11 = scalar_lea.vmem %s1672_s9, %s1107_s14 }
  0x11   : > { %511 = vmatpush1.bf16.msra.mxu0 %v1311_v5  ;;  %v1332_v16 = vld [vmem:[%s1664_s1 + $0x80] ss:$12 sps:$4 sm:$0xff]   ;;  %v1324_v17 = vld [vmem:[%s1664_s1 + $0x1c] ss:$12 sps:$4 sm:$0xff]   ;;  %v1327_v20 = vld [vmem:[%s1664_s1 + $0x4] ss:$12 sps:$4 sm:$0xff]  }
  0x12   : > { %512 = vmatprep.subr.bf16.mxu0 %v1312_v6  ;;  %v1333_v18 = vld [vmem:[%s1664_s1 + $0x68] ss:$12 sps:$4 sm:$0xff]   ;;  %v1334_v21 = vld [vmem:[%s1664_s1 + $0x50] ss:$12 sps:$4 sm:$0xff]   ;;  %v1329_v22 = vld [vmem:[%s1664_s1] ss:$12 sps:$4 sm:$0xff]  }
  0x13   : > { %1206 = vmatpush3.bf16.msra.mxu1 %v1331_v12  ;;  %v1512_v23 = vld [vmem:[%s323_s15] sm:$0xff]  ;;  %v1337_v27 = vld [vmem:[%s1664_s1 + $0x8] ss:$12 sps:$4 sm:$0xff]   ;;  %v371_v30 = vsub.s32 1, %v366_v29  ;;  %v367_v33 = vsub.s32 0, %v366_v29  ;;  %v375_v43 = vsub.s32 2, %v366_v29 }
  0x14   : > { %1207 = vmatprep.subr.bf16.mxu1 %v1377_v4  ;;  %v1335_v24 = vld [vmem:[%s1664_s1 + $0x38] ss:$12 sps:$4 sm:$0xff]   ;;  %v330_v25 = vpack.c.bf16 %v1512_v23, %v1512_v23  ;;  %v1336_v26 = vld [vmem:[%s1664_s1 + $0x20] ss:$12 sps:$4 sm:$0xff]   ;;  %vm655_vm1 = vcmask 1043456   ;;  %v635_v52 = vand.u32 127, %v365_v28 }
  0x15   : > { %513 = vmatpush1.bf16.msra.mxu0 %v1314_v7  ;;  %v363_v31 = vld [vmem:[%s1665_s2] sm:$0x7]  ;;  %vm638_vm3 = vcmask 64512   ;;  %v1338_v1 = vld [vmem:[%s1666_s3 + $0x38] sm:$0xff]   ;;  %v1339_v2 = vld [vmem:[%s1666_s3 + $0x30] sm:$0xff]  }
  0x16   : > { %514 = vmatprep.subr.bf16.mxu0 %v1315_v8  ;;  %v372_v32 = vrot.slane %v363_v31, %v371_v30  ;;  %v368_v37 = vrot.slane %v363_v31, %v367_v33  ;;  %v376_v44 = vrot.slane %v363_v31, %v375_v43  ;;  %vm636_vm2 = vcmp.le.s32.totalorder %v635_v52, %v366_v29  ;;  %v1340_v3 = vld [vmem:[%s1666_s3 + $0x28] sm:$0xff]   ;;  %v1341_v5 = vld [vmem:[%s1666_s3 + $0x20] sm:$0xff]   ;;  %v1342_v6 = vld [vmem:[%s1666_s3 + $0x18] sm:$0xff]  }
  0x17   : > { %1208 = vmatpush3.bf16.msra.mxu1 %v1332_v16  ;;  %v1343_v7 = vld [vmem:[%s1666_s3 + $0x10] sm:$0xff]   ;;  %v1344_v8 = vld [vmem:[%s1666_s3 + $0x8] sm:$0xff]   ;;  %v1142_v29 = vld [vmem:[%s1667_s4] ss:$0 sm:$0xff] }
  0x18   : > { %1209 = vmatprep.subr.bf16.mxu1 %v1377_v4  ;;  %v1348_v16 = vld [vmem:[%s1668_s5 + $0x28] sm:$0xff]   ;;  %v1143_v43 = vld [vmem:[%s1669_s6] ss:$0 sm:$0xff] }
  0x19   : > { %515 = vmatpush1.bf16.msra.mxu0 %v1317_v9 }
  0x1a   : > { %516 = vmatprep.subr.bf16.mxu0 %v1318_v11 }
  0x1b   : > { %1210 = vmatpush3.bf16.msra.mxu1 %v1333_v18  ;;  %v1350_v18 = vld [vmem:[%s1668_s5 + $0x18] sm:$0xff]  }
  0x1c   : > { %1211 = vmatprep.subr.bf16.mxu1 %v1377_v4 }
  0x1d   : > { %517 = vmatpush1.bf16.msra.mxu0 %v1320_v13  ;;  %v1345_v13 = vld [vmem:[%s1666_s3] sm:$0xff]  }
  0x1e   : > { %518 = vmatprep.subr.bf16.mxu0 %v1321_v14  ;;  %v1346_v14 = vld [vmem:[%s1668_s5 + $0x38] sm:$0xff]  }
  0x1f   : > { %1212 = vmatpush3.bf16.msra.mxu1 %v1334_v21 }
  0x20   : > { %1213 = vmatprep.subr.bf16.mxu1 %v1377_v4 }
  0x21   : > { %519 = vmatpush1.bf16.msra.mxu0 %v1323_v15  ;;  %v1347_v15 = vld [vmem:[%s1668_s5 + $0x30] sm:$0xff]  }
  0x22   : > { %520 = vmatprep.subr.bf16.mxu0 %v1324_v17  ;;  %v1349_v17 = vld [vmem:[%s1668_s5 + $0x20] sm:$0xff]  }
  0x23   : > { %1214 = vmatpush3.bf16.msra.mxu1 %v1335_v24 }
  0x24   : > { %1215 = vmatprep.subr.bf16.mxu1 %v1377_v4 }
  0x25   : > { %521 = vmatpush1.bf16.msra.mxu0 %v1326_v19  ;;  %v1351_v19 = vld [vmem:[%s1668_s5 + $0x10] sm:$0xff]  }
  0x26   : > { %522 = vmatprep.subr.bf16.mxu0 %v1327_v20 }
  0x27   : > { %1216 = vmatpush3.bf16.msra.mxu1 %v1336_v26  ;;  %v1352_v26 = vld [vmem:[%s1668_s5 + $0x8] sm:$0xff]  }
  0x28   : > { %1217 = vmatprep.subr.bf16.mxu1 %v1377_v4 }
  0x29   : > { %523 = vmatpush1.bf16.msra.mxu0 %v1329_v22 }
  0x2a   : > { %1235 = vmatprep.subr.bf16.mxu0 %v1377_v4 }
  0x2b   : > { %1218 = vmatpush3.bf16.msra.mxu1 %v1337_v27  ;;  %v1353_v27 = vld [vmem:[%s1668_s5] sm:$0xff]  }
  0x2c   : > { %541 = vmatmul.mubr.bf16.vlgmr.msra.gmra.mxu0 %v330_v25  ;;  %1223 = vmatprep.subr.bf16.mxu1 %v1377_v4 }
  0x2d   : > { %1251 = vmatprep.mubr.msk.bf16.mxu0 %vm1378_vm0, %v1377_v4  ;;  %1236 = vmatpush3.bf16.msra.mxu0 %v1338_v1 }
  0x2e   : > { %1220 = vmatmul.mubr.bf16.vlgmr.msra.gmra.mxu1 %v330_v25  ;;  %1237 = vmatprep.subr.bf16.mxu0 %v1377_v4 }
  0x2f   : > { %1225 = vmatprep.mubr.msk.bf16.mxu1 %vm1378_vm0, %v1377_v4 }
  0x31   : > { %1238 = vmatpush3.bf16.msra.mxu0 %v1339_v2 }
  0x32   : > { %1239 = vmatprep.subr.bf16.mxu0 %v1377_v4 }
  0x35   : > { %1240 = vmatpush3.bf16.msra.mxu0 %v1340_v3 }
  0x36   : > { %1241 = vmatprep.subr.bf16.mxu0 %v1377_v4 }
  0x39   : > { %1242 = vmatpush3.bf16.msra.mxu0 %v1341_v5 }
  0x3a   : > { %1243 = vmatprep.subr.bf16.mxu0 %v1377_v4 }
  0x3d   : > { %1244 = vmatpush3.bf16.msra.mxu0 %v1342_v6 }
  0x3e   : > { %1245 = vmatprep.subr.bf16.mxu0 %v1377_v4 }
  0x41   : > { %1246 = vmatpush3.bf16.msra.mxu0 %v1343_v7 }
  0x42   : > { %1247 = vmatprep.subr.bf16.mxu0 %v1377_v4 }
  0x45   : > { %1248 = vmatpush3.bf16.msra.mxu0 %v1344_v8 }
  0x46   : > { %1249 = vmatprep.subr.bf16.mxu0 %v1377_v4 }
  0x49   : > { %1250 = vmatpush3.bf16.msra.mxu0 %v1345_v13 }
  0x4a   : > { %1275 = vmatprep.subr.bf16.mxu0 %v1377_v4 }
  0xec   : > { %v542_v34 = vpop.f32.mrf.mxu0 }
  0xed   : > { %v543_v41 = vadd.f32 %v542_v34, %v368_v37  ;;  %v1355_v37 = vld [vmem:[%s1670_s7 + $0x30] sm:$0xff]  }
  0xee   : > { %v544_v35 = vpop.f32.mrf.mxu0  ;;  %v583_v45 = vpop.f32.mrf.mxu1 }
  0xef   : > { %v545_v36 = vadd.f32 %v544_v35, %v372_v32  ;;  %v589_v42 = vpack.c.bf16 %v543_v41, %v543_v41  ;;  %v584_v46 = vadd.f32 %v583_v45, %v376_v44  ;;  %v1360_v41 = vld [vmem:[%s1670_s7 + $0x8] sm:$0xff]  }
  0xf0   : > { %v546_v38 = vpop.f32.mrf.mxu0  ;;  %v1221_v47 = vpop.f32.mrf.mxu1 }
  0xf1   : > { %v590_v39 = vpack.c.bf16 %v545_v36, %v545_v36  ;;  %v651_v48 = vpack.c.bf16 %v584_v46, %v584_v46  ;;  %v1354_v36 = vld [vmem:[%s1670_s7 + $0x38] sm:$0xff]   ;;  %v1357_v38 = vld [vmem:[%s1670_s7 + $0x20] sm:$0xff]  }
  0xf2   : > { %v547_v40 = vpop.f32.mrf.mxu0  ;;  %v586_v49 = vpop.f32.mrf.mxu1 }
  0xf3   : > { %1224 = vmatpush3.bf16.xpose.msra.mxu1 %v590_v39  ;;  %v657_v50 = vsel %vm655_vm1, %v651_v48, 0  ;;  %v1358_v39 = vld [vmem:[%s1670_s7 + $0x18] sm:$0xff]   ;;  %v1359_v40 = vld [vmem:[%s1670_s7 + $0x10] sm:$0xff]  }
  0xf4   : > { %1229 = vmatprep.subr.bf16.mxu1 %v1377_v4  ;;  %v1222_v51 = vpop.f32.mrf.mxu1 }
  0xfa   : > { %1226 = vmatmul.mubr.bf16.vlgmr.msra.gmra.mxu1 %v589_v42  ;;  %v1361_v42 = vld [vmem:[%s1670_s7] sm:$0xff]  }
  0xfb   : > { %1231 = vmatprep.mubr.msk.bf16.mxu1 %vm1378_vm0, %v1377_v4  ;;  %1230 = vmatpush3.bf16.msra.mxu1 %v657_v50 }
  0xfc   : > { %1255 = vmatprep.subr.bf16.mxu1 %v1377_v4 }
 0x1ba   : > { %v625_v53 = vpop.f32.mrf.mxu1 }
 0x1bb   : > { %v631_v54 = vmul.f32 0.17677669, %v625_v53 }
 0x1bc   : > { %v1227_v55 = vpop.f32.mrf.mxu1 }
 0x1bd   : > { %v637_v56 = vsel %vm636_vm2, %v631_v54, -1e+30 }
 0x1be   : > { %v628_v57 = vpop.f32.mrf.mxu1  ;;  %v639_v58 = vsel %vm638_vm3, %v637_v56, -inf }
 0x1bf   : > { %640 = vmax.xlane.f32.xlu0 %v639_v58 }
 0x1c0   : > { %v1228_v59 = vpop.f32.mrf.mxu1 }
 0x1c1   : > { %v1160_v59 = vld [vmem:[%s1671_s8] ss:$0 sm:$0xff] }
 0x248   : > { %v641_v60 = vpop.xlane.xlu0 %640 }
 0x249   : > { %v642_v61 = vsub.f32 %v637_v56, %v641_v60 }
 0x24b   : > { %v643_v62 = vmul.f32 1.442695, %v642_v61 }
 0x24d   : > { %1362 = vpow2.f32 %v643_v62 }
 0x25a   : > { %v1363_v63 = vpop.eup %1362 }
 0x25b   : > { %v645_v0 = vsel %vm638_vm3, %v1363_v63, 0.0 }
 0x25c   : > { %646 = vadd.xlane.f32.xlu0 %v645_v0 }
 0x2e5   : > { %v647_v9 = vpop.xlane.xlu0 %646 }
 0x2e6   : > { %1364 = vrcp.f32 %v647_v9 }
 0x2f3   : > { %v1365_v10 = vpop.eup %1364 }
 0x2f4   : > { %v649_v11 = vmul.f32 %v1365_v10, %v1363_v63 }
 0x2f6   : > { %v650_v12 = vpack.c.bf16 %v649_v11, %v649_v11 }
 0x2f8   : > { %1232 = vmatmul.mubr.msk.bf16.vlgmr.msra.gmra.mxu1 %vm638_vm3, %v650_v12 }
 0x2f9   : > { %1271 = vmatprep.mubr.msk.bf16.mxu1 %vm1378_vm0, %v1377_v4  ;;  %1256 = vmatpush3.bf16.msra.mxu1 %v1346_v14 }
 0x2fa   : > { %1257 = vmatprep.subr.bf16.mxu1 %v1377_v4 }
 0x2fd   : > { %1258 = vmatpush3.bf16.msra.mxu1 %v1347_v15 }
 0x2fe   : > { %1259 = vmatprep.subr.bf16.mxu1 %v1377_v4 }
 0x301   : > { %1260 = vmatpush3.bf16.msra.mxu1 %v1348_v16 }
 0x302   : > { %1261 = vmatprep.subr.bf16.mxu1 %v1377_v4 }
 0x305   : > { %1262 = vmatpush3.bf16.msra.mxu1 %v1349_v17 }
 0x306   : > { %1263 = vmatprep.subr.bf16.mxu1 %v1377_v4 }
 0x309   : > { %1264 = vmatpush3.bf16.msra.mxu1 %v1350_v18 }
 0x30a   : > { %1265 = vmatprep.subr.bf16.mxu1 %v1377_v4 }
 0x30d   : > { %1266 = vmatpush3.bf16.msra.mxu1 %v1351_v19 }
 0x30e   : > { %1267 = vmatprep.subr.bf16.mxu1 %v1377_v4 }
 0x311   : > { %1268 = vmatpush3.bf16.msra.mxu1 %v1352_v26 }
 0x312   : > { %1269 = vmatprep.subr.bf16.mxu1 %v1377_v4 }
 0x315   : > { %1270 = vmatpush3.bf16.msra.mxu1 %v1353_v27 }
 0x3b8   : > { %v693_v20 = vpop.f32.mrf.mxu1 }
 0x3b9   : > { %v699_v21 = vpack.c.bf16 %v693_v20, %v693_v20 }
 0x3ba   : > { %v1233_v22 = vpop.f32.mrf.mxu1 }
 0x3bb   : > { %1252 = vmatmul.mubr.bf16.vlgmr.msra.gmra.mxu0 %v699_v21 }
 0x3bc   : > { %v696_v24 = vpop.f32.mrf.mxu1  ;;  %1291 = vmatprep.mubr.msk.bf16.mxu0 %vm1378_vm0, %v1377_v4  ;;  %1276 = vmatpush3.bf16.msra.mxu0 %v1354_v36 }
 0x3bd   : > { %1277 = vmatprep.subr.bf16.mxu0 %v1377_v4 }
 0x3be   : > { %v1234_v25 = vpop.f32.mrf.mxu1 }
 0x3c0   : > { %1278 = vmatpush3.bf16.msra.mxu0 %v1355_v37 }
 0x3c1   : > { %1279 = vmatprep.subr.bf16.mxu0 %v1377_v4 }
 0x47b   : > { %v798_v28 = vpop.f32.mrf.mxu0 }
 0x47c   : > { %v804_v30 = vadd.f32 %v798_v28, %v1512_v23  ;;  %v1356_v23 = vld [vmem:[%s1670_s7 + $0x28] sm:$0xff]  }
 0x47d   : > { %v1253_v31 = vpop.f32.mrf.mxu0  ;;  %1280 = vmatpush3.bf16.msra.mxu0 %v1356_v23 }
 0x47e   : > { %v812_v32 = vadd.f32 %v1142_v29, %v804_v30  ;;  %1281 = vmatprep.subr.bf16.mxu0 %v1377_v4 }
 0x47f   : > { %v801_v33 = vpop.f32.mrf.mxu0 }
 0x480   : > { %v813_v34 = vpack.c.bf16 %v812_v32, %v812_v32 }
 0x481   : > { %v1254_v35 = vpop.f32.mrf.mxu0  ;;  %1282 = vmatpush3.bf16.msra.mxu0 %v1357_v38 }
 0x482   : > { %1272 = vmatmul.mubr.bf16.vlgmr.msra.gmra.mxu1 %v813_v34  ;;  %1283 = vmatprep.subr.bf16.mxu0 %v1377_v4 }
 0x485   : > { %1284 = vmatpush3.bf16.msra.mxu0 %v1358_v39 }
 0x486   : > { %1285 = vmatprep.subr.bf16.mxu0 %v1377_v4 }
 0x489   : > { %1286 = vmatpush3.bf16.msra.mxu0 %v1359_v40 }
 0x48a   : > { %1287 = vmatprep.subr.bf16.mxu0 %v1377_v4 }
 0x48d   : > { %1288 = vmatpush3.bf16.msra.mxu0 %v1360_v41 }
 0x48e   : > { %1289 = vmatprep.subr.bf16.mxu0 %v1377_v4 }
 0x491   : > { %1290 = vmatpush3.bf16.msra.mxu0 %v1361_v42 }
 0x542   : > { %v919_v44 = vpop.f32.mrf.mxu1 }
 0x543   : > { %v920_v45 = vadd.f32 %v1143_v43, %v919_v44 }
 0x544   : > { %v1273_v46 = vpop.f32.mrf.mxu1 }
 0x545   : > { %v925_v47 = vmul.f32 %v920_v45, %v920_v45 }
 0x546   : > { %v922_v48 = vpop.f32.mrf.mxu1 }
 0x547   : > { %v926_v49 = vmul.f32 %v925_v47, %v920_v45 }
 0x548   : > { %v1274_v50 = vpop.f32.mrf.mxu1 }
 0x549   : > { %v927_v51 = vmul.f32 0.044715, %v926_v49 }
 0x54b   : > { %v928_v52 = vadd.f32 %v927_v51, %v920_v45 }
 0x54d   : > { %v929_v53 = vmul.f32 0.7978846, %v928_v52 }
 0x54f   : > { %1366 = vtanh.f32 %v929_v53 }
 0x55c   : > { %v1367_v54 = vpop.eup %1366 }
 0x55d   : > { %v931_v55 = vadd.f32 1.0, %v1367_v54 }
 0x55f   : > { %v932_v4 = vmul.f32 0.5, %v931_v55 }
 0x561   : > { %v933_v56 = vmul.f32 %v932_v4, %v920_v45 }
 0x563   : > { %v934_v57 = vpack.c.bf16 %v933_v56, %v933_v56 }
 0x565   : > { %1292 = vmatmul.mubr.bf16.vlgmr.msra.gmra.mxu0 %v934_v57 }
 0x625   : > { %v1033_v58 = vpop.f32.mrf.mxu0 }
 0x626   : > { %v1039_v60 = vadd.f32 %v1033_v58, %v812_v32 }
 0x627   : > { %v1293_v61 = vpop.f32.mrf.mxu0 }
 0x628   : > { %v1047_v62 = vadd.f32 %v1160_v59, %v1039_v60 }
 0x629   : > { %v1036_v63 = vpop.f32.mrf.mxu0 }
 0x62a   : > { %1048 = vst [vmem:[%s327_s11] sm:$0xff] %v1047_v62 }
 0x62b   : > { %v1294_v0 = vpop.f32.mrf.mxu0 }
 0x62c PF: > { %s19_s30 = sadd.s32 1, %s1374_s30  }
 0x62d   : > { %p16_p4 = scmp.ge.s32.totalorder %s19_s30, 4  }
 0x62f   :  { %18 = sbr.rel (!%p16_p4) target bundleno = 1 (0x1), region = 86 }

</bundles_post_ra>
